<compile_context>
chip_gen: v7x
topology: tpu7x:2x2x1
jax: 0.10.0
libtpu: 0.0.40
codegen_flags: <defaults>
</compile_context>

<pallas_src>
import jax
import jax.numpy as jnp
from jax.experimental import pallas as pl
from jax.experimental.pallas import tpu as pltpu


def _pooler_kernel(adj_ref, x_ref, noise_ref,
                   w1_ref, b1_ref, w2_ref, b2_ref,
                   wl_ref, wmv_ref, pool_ref,
                   out_ref):
    Z = noise_ref.shape[1]
    cdt = x_ref.dtype                                 # compute dtype (f32 or bf16)

    adj = adj_ref[...]                                # (M, M) block-diagonal tile
    x = x_ref[...]                                    # (M, D) flattened node rows

    # hidden = tanh(fc1(X)); fc1: D -> 128   (one big MXU matmul for all rows)
    h = jnp.tanh(
        jnp.dot(x, w1_ref[...], preferred_element_type=jnp.float32) + b1_ref[...])
    # hidden = tanh(fc2(hidden)); fc2: 128 -> H
    h = jnp.tanh(
        jnp.dot(h.astype(cdt), w2_ref[...],
                preferred_element_type=jnp.float32) + b2_ref[...])

    # base_net: num_layers x  h = tanh(A_blockdiag @ (h @ W_l)) -- two matmuls/layer
    num_layers = wl_ref.shape[0]
    for l in range(num_layers):
        hw = jnp.dot(h.astype(cdt), wl_ref[l], preferred_element_type=jnp.float32)
        h = jnp.tanh(jnp.dot(adj, hw.astype(cdt),
                             preferred_element_type=jnp.float32))

    # mean / logvar graph convolutions fused: W_mv = [W_mean | W_logvar] (H, 2Z)
    hmv = jnp.dot(h.astype(cdt), wmv_ref[...], preferred_element_type=jnp.float32)
    mv = jnp.tanh(jnp.dot(adj, hmv.astype(cdt),
                          preferred_element_type=jnp.float32))          # (M, 2Z)

    # per-graph mean over nodes as a matmul with the constant (Bt, M) 1/N matrix
    pooled = jnp.dot(pool_ref[...], mv, preferred_element_type=jnp.float32)  # (Bt, 2Z)
    pooled_mean = pooled[:, :Z]
    pooled_logvar = pooled[:, Z:]

    # latent = noise * exp(0.5 * pooled_logvar) + pooled_mean   (all f32 on VPU/EUP)
    latent = noise_ref[...] * jnp.exp(0.5 * pooled_logvar) + pooled_mean

    # one full-width lane-dense store: [latent | mean | logvar | 0-pad]
    bt = pooled.shape[0]
    pad = out_ref.shape[1] - 3 * Z
    pieces = [latent, pooled]
    if pad:
        pieces.append(jnp.zeros((bt, pad), jnp.float32))
    out_ref[...] = jnp.concatenate(pieces, axis=1).astype(out_ref.dtype)


def _pick_block_b(B, N, max_rows=256):
    """Batch tile: divisor of B with Bt*N <= max_rows (MXU/VMEM friendly),
    layout-legal under the (8,128) rule, preferring an even grid >= 2 (v7x 2 TCs)."""
    cap = max(1, min(B, max(1, max_rows // max(N, 1))))
    divs = [d for d in range(1, B + 1) if B % d == 0 and d <= cap]

    def legal(d):
        full = (d == B)
        return (full or d % 8 == 0) and (full or (d * N) % 8 == 0)

    for pred in (lambda d: legal(d) and (B // d) >= 2 and (B // d) % 2 == 0,
                 lambda d: legal(d) and (B // d) >= 2,
                 lambda d: legal(d)):
        cands = [d for d in divs if pred(d)]
        if cands:
            return max(cands)
    return B


def graph_pooler_forward(adj, X, noise, params, *, compute_dtype=jnp.float32,
                         max_rows_per_tile=256):
    """GraphPooler forward pass with one Pallas kernel call.

    compute_dtype=jnp.bfloat16 halves HBM bytes / vreg footprint and uses the
    bf16-native MXU; all dot outputs stay f32 and elementwise math stays f32.
    """
    B, N, D = X.shape
    Z = params["wm"].shape[1]
    L, H, _ = params["wl"].shape
    cdt = compute_dtype

    Bt = _pick_block_b(B, N, max_rows_per_tile)
    G = B // Bt
    M = Bt * N
    OUT_W = ((3 * Z + 127) // 128) * 128              # lane-dense, >= 128 wide

    # Per-tile block-diagonal adjacency: (G, M, M).  The zero blocks are "free"
    # MXU flops (the N=8 contracting dim used 8/128 of the array anyway) and
    # collapse Bt batched (N,N)@(N,K) dots into one (M,M)@(M,K) matmul / layer.
    adj_bd = jnp.einsum(
        "gbij,bc->gbicj",
        adj.reshape(G, Bt, N, N).astype(cdt),
        jnp.eye(Bt, dtype=cdt),
    ).reshape(G, M, M)

    x_flat = X.reshape(B * N, D).astype(cdt)          # layout change done by XLA
    noise2 = noise.reshape(B, Z).astype(jnp.float32)  # drop size-1 sublane dim

    w1 = params["w1"].astype(cdt)
    b1 = params["b1"].astype(jnp.float32)
    w2 = params["w2"].astype(cdt)
    b2 = params["b2"].astype(jnp.float32)
    wl = params["wl"].astype(cdt)
    wmv = jnp.concatenate([params["wm"], params["wv"]], axis=1).astype(cdt)  # (H, 2Z)

    # Constant mean-pooling matrix: pool[b, b*N + k] = 1/N.
    pool = jnp.repeat(jnp.eye(Bt, dtype=jnp.float32), N, axis=1) / float(N)  # (Bt, M)

    # Explicit VMEM budget: 2x double-buffered tiles + weights + live activations,
    # clamped to fit v7x's 64 MiB physical VMEM and lift v5e's 16 MiB default.
    isz = jnp.dtype(cdt).itemsize
    in_tile = M * M * isz + M * D * isz + Bt * Z * 4
    w_bytes = ((D * 128 + 128 * H + L * H * H + H * 2 * Z) * isz
               + (128 + H) * 4 + Bt * M * 4)
    out_tile = Bt * OUT_W * 4
    act_bytes = M * 128 * 4 + 4 * M * max(H, 2 * Z) * 4
    est = 2 * (in_tile + w_bytes + out_tile) + act_bytes + (2 << 20)
    vmem_limit = int(min(48 << 20, max(est, 16 << 20)))

    grid_spec = pltpu.PrefetchScalarGridSpec(
        num_scalar_prefetch=0,
        grid=(G,),
        in_specs=[
            pl.BlockSpec((None, M, M), lambda g: (g, 0, 0)),   # block-diag adj tile
            pl.BlockSpec((M, D), lambda g: (g, 0)),            # flattened X tile
            pl.BlockSpec((Bt, Z), lambda g: (g, 0)),           # noise tile
            pl.BlockSpec((D, 128), lambda g: (0, 0)),          # fc1 weight (in,out)
            pl.BlockSpec((1, 128), lambda g: (0, 0)),          # fc1 bias (f32)
            pl.BlockSpec((128, H), lambda g: (0, 0)),          # fc2 weight
            pl.BlockSpec((1, H), lambda g: (0, 0)),            # fc2 bias (f32)
            pl.BlockSpec((L, H, H), lambda g: (0, 0, 0)),      # base_net weights
            pl.BlockSpec((H, 2 * Z), lambda g: (0, 0)),        # [mean|logvar] weight
            pl.BlockSpec((Bt, M), lambda g: (0, 0)),           # 1/N pooling matrix
        ],
        out_specs=pl.BlockSpec((Bt, OUT_W), lambda g: (g, 0)),
    )

    out = pl.pallas_call(
        _pooler_kernel,
        out_shape=jax.ShapeDtypeStruct((B, OUT_W), jnp.float32),
        grid_spec=grid_spec,
        compiler_params=pltpu.CompilerParams(
            dimension_semantics=("parallel",),
            vmem_limit_bytes=vmem_limit),
    )(adj_bd, x_flat, noise2, w1, b1, w2, b2, wl, wmv, pool)

    latent = out[:, 0 * Z:1 * Z][:, None, :]
    pooled_mean = out[:, 1 * Z:2 * Z][:, None, :]
    pooled_logvar = out[:, 2 * Z:3 * Z][:, None, :]
    return latent, pooled_mean, pooled_logvar


def init_params(key, input_dim, hidden_dim, z_dim, num_layers):
    """Deterministic glorot-style init, weights stored as (in, out)."""
    def glorot(k, fan_in, fan_out):
        lim = jnp.sqrt(6.0 / (fan_in + fan_out))
        return jax.random.uniform(k, (fan_in, fan_out), jnp.float32, -lim, lim)

    keys = jax.random.split(key, 6 + num_layers)
    w1 = glorot(keys[0], input_dim, 128)
    b1 = jnp.zeros((1, 128), jnp.float32)
    w2 = glorot(keys[1], 128, hidden_dim)
    b2 = jnp.zeros((1, hidden_dim), jnp.float32)
    wl = jnp.stack([glorot(keys[2 + l], hidden_dim, hidden_dim)
                    for l in range(num_layers)], axis=0)
    wm = glorot(keys[2 + num_layers], hidden_dim, z_dim)
    wv = glorot(keys[3 + num_layers], hidden_dim, z_dim)
    return {"w1": w1, "b1": b1, "w2": w2, "b2": b2,
            "wl": wl, "wm": wm, "wv": wv}


def _reference_forward(adj, X, noise, params):
    """Pure-JAX reference mirroring the PyTorch module (for sanity check)."""
    h = jnp.tanh(jnp.einsum("bnd,dk->bnk", X, params["w1"]) + params["b1"])
    h = jnp.tanh(jnp.einsum("bnd,dk->bnk", h, params["w2"]) + params["b2"])
    for l in range(params["wl"].shape[0]):
        h = jnp.tanh(jnp.einsum("bnm,bmk->bnk", adj,
                                jnp.einsum("bnd,dk->bnk", h, params["wl"][l])))
    mean = jnp.tanh(jnp.einsum("bnm,bmk->bnk", adj,
                               jnp.einsum("bnd,dk->bnk", h, params["wm"])))
    logvar = jnp.tanh(jnp.einsum("bnm,bmk->bnk", adj,
                                 jnp.einsum("bnd,dk->bnk", h, params["wv"])))
    pm = jnp.mean(mean, axis=1, keepdims=True)
    pv = jnp.mean(logvar, axis=1, keepdims=True)
    latent = noise * jnp.exp(0.5 * pv) + pm
    return latent, pm, pv


if __name__ == "__main__":
    # Small shapes consistent with the module defaults (hidden_dim=32, z_dim=32).
    # B=16, N=8 -> Bt=8, M=64, grid=(2,): even grid exercises both v7x TCs.
    B, N, D = 16, 8, 16
    HIDDEN, ZDIM, NUM_LAYERS = 32, 32, 3

    key = jax.random.PRNGKey(0)
    k_adj, k_x, k_noise, k_params = jax.random.split(key, 4)

    # Symmetric non-negative "adjacency"-like matrix, node features, noise.
    # TODO(synk): torch.randn inside forward is replaced by pre-sampled noise input.
    a = jax.random.uniform(k_adj, (B, N, N), jnp.float32)
    adj = 0.5 * (a + jnp.swapaxes(a, 1, 2))
    X = jax.random.normal(k_x, (B, N, D), jnp.float32)
    noise = jax.random.normal(k_noise, (B, 1, ZDIM), jnp.float32)

    params = init_params(k_params, D, HIDDEN, ZDIM, NUM_LAYERS)

    # f32 path: bit-level comparable to the pure-JAX reference.
    latent, pooled_mean, pooled_logvar = graph_pooler_forward(adj, X, noise, params)
    jax.block_until_ready((latent, pooled_mean, pooled_logvar))

    ref_latent, ref_pm, ref_pv = _reference_forward(adj, X, noise, params)
    assert jnp.allclose(latent, ref_latent, atol=1e-4, rtol=1e-4)
    assert jnp.allclose(pooled_mean, ref_pm, atol=1e-4, rtol=1e-4)
    assert jnp.allclose(pooled_logvar, ref_pv, atol=1e-4, rtol=1e-4)

    # bf16 compute path (production setting): loose tolerance, values are tanh-bounded.
    lat_bf, pm_bf, pv_bf = graph_pooler_forward(
        adj, X, noise, params, compute_dtype=jnp.bfloat16)
    jax.block_until_ready((lat_bf, pm_bf, pv_bf))
    assert bool(jnp.all(jnp.isfinite(lat_bf)))
    assert jnp.allclose(lat_bf, ref_latent, atol=0.2, rtol=0.1)
    assert jnp.allclose(pm_bf, ref_pm, atol=0.2, rtol=0.1)
    assert jnp.allclose(pv_bf, ref_pv, atol=0.2, rtol=0.1)

    print("KERNEL_OK")
</pallas_src>

<mosaic_0001>
module attributes {stable_mosaic.version = 11 : i64} {
  func.func @_pooler_kernel(%arg0: i32, %arg1: memref<1x64x64xf32, #tpu.memory_space<vmem>>, %arg2: memref<64x16xf32, #tpu.memory_space<vmem>>, %arg3: memref<8x32xf32, #tpu.memory_space<vmem>>, %arg4: memref<16x128xf32, #tpu.memory_space<vmem>>, %arg5: memref<1x128xf32, #tpu.memory_space<vmem>>, %arg6: memref<128x32xf32, #tpu.memory_space<vmem>>, %arg7: memref<1x32xf32, #tpu.memory_space<vmem>>, %arg8: memref<3x32x32xf32, #tpu.memory_space<vmem>>, %arg9: memref<32x64xf32, #tpu.memory_space<vmem>>, %arg10: memref<8x64xf32, #tpu.memory_space<vmem>>, %arg11: memref<8x128xf32, #tpu.memory_space<vmem>>) attributes {dimension_semantics = [#tpu.dimension_semantics<parallel>], iteration_bounds = array<i64: 2>, scalar_prefetch = 0 : i64, scratch_operands = 0 : i64, tpu.core_type = #tpu.core_type<tc>, window_params = [{transform_indices = @transform_0, window_bounds = array<i64: 1, 64, 64>}, {transform_indices = @transform_1, window_bounds = array<i64: 64, 16>}, {transform_indices = @transform_2, window_bounds = array<i64: 8, 32>}, {pipeline_mode = #tpu.pipeline_mode<synchronous>, transform_indices = @transform_3, window_bounds = array<i64: 16, 128>}, {pipeline_mode = #tpu.pipeline_mode<synchronous>, transform_indices = @transform_4, window_bounds = array<i64: 1, 128>}, {pipeline_mode = #tpu.pipeline_mode<synchronous>, transform_indices = @transform_5, window_bounds = array<i64: 128, 32>}, {pipeline_mode = #tpu.pipeline_mode<synchronous>, transform_indices = @transform_6, window_bounds = array<i64: 1, 32>}, {pipeline_mode = #tpu.pipeline_mode<synchronous>, transform_indices = @transform_7, window_bounds = array<i64: 3, 32, 32>}, {pipeline_mode = #tpu.pipeline_mode<synchronous>, transform_indices = @transform_8, window_bounds = array<i64: 32, 64>}, {pipeline_mode = #tpu.pipeline_mode<synchronous>, transform_indices = @transform_9, window_bounds = array<i64: 8, 64>}, {transform_indices = @transform_10, window_bounds = array<i64: 8, 128>}]} {
    %c0 = arith.constant 0 : index
    %c0_0 = arith.constant 0 : index
    %c0_1 = arith.constant 0 : index
    %0 = vector.load %arg1[%c0, %c0_0, %c0_1] : memref<1x64x64xf32, #tpu.memory_space<vmem>>, vector<1x64x64xf32>
    %1 = vector.shape_cast %0 : vector<1x64x64xf32> to vector<64x64xf32>
    %c0_2 = arith.constant 0 : index
    %c0_3 = arith.constant 0 : index
    %2 = vector.load %arg2[%c0_2, %c0_3] : memref<64x16xf32, #tpu.memory_space<vmem>>, vector<64x16xf32>
    %c0_4 = arith.constant 0 : index
    %c0_5 = arith.constant 0 : index
    %3 = vector.load %arg4[%c0_4, %c0_5] : memref<16x128xf32, #tpu.memory_space<vmem>>, vector<16x128xf32>
    %cst = arith.constant dense<0.000000e+00> : vector<64x128xf32>
    %4 = tpu.matmul %2, %3, %cst {dimension_numbers = #tpu.dot_dimension_numbers<[1], [0], [0], [1], [0, 0, 1, 1], [], []>} : vector<64x16xf32>, vector<16x128xf32>, vector<64x128xf32> -> vector<64x128xf32>
    %c0_6 = arith.constant 0 : index
    %c0_7 = arith.constant 0 : index
    %5 = vector.load %arg5[%c0_6, %c0_7] : memref<1x128xf32, #tpu.memory_space<vmem>>, vector<1x128xf32>
    %6 = vector.broadcast %5 : vector<1x128xf32> to vector<64x128xf32>
    %7 = arith.addf %4, %6 : vector<64x128xf32>
    %8 = math.tanh %7 : vector<64x128xf32>
    %c0_8 = arith.constant 0 : index
    %c0_9 = arith.constant 0 : index
    %9 = vector.load %arg6[%c0_8, %c0_9] : memref<128x32xf32, #tpu.memory_space<vmem>>, vector<128x32xf32>
    %cst_10 = arith.constant dense<0.000000e+00> : vector<64x32xf32>
    %10 = tpu.matmul %8, %9, %cst_10 {dimension_numbers = #tpu.dot_dimension_numbers<[1], [0], [0], [1], [0, 0, 1, 1], [], []>} : vector<64x128xf32>, vector<128x32xf32>, vector<64x32xf32> -> vector<64x32xf32>
    %c0_11 = arith.constant 0 : index
    %c0_12 = arith.constant 0 : index
    %11 = vector.load %arg7[%c0_11, %c0_12] : memref<1x32xf32, #tpu.memory_space<vmem>>, vector<1x32xf32>
    %12 = vector.broadcast %11 : vector<1x32xf32> to vector<64x32xf32>
    %13 = arith.addf %10, %12 : vector<64x32xf32>
    %14 = math.tanh %13 : vector<64x32xf32>
    %c0_13 = arith.constant 0 : index
    %c0_14 = arith.constant 0 : index
    %c0_15 = arith.constant 0 : index
    %15 = vector.load %arg8[%c0_13, %c0_14, %c0_15] : memref<3x32x32xf32, #tpu.memory_space<vmem>>, vector<1x32x32xf32>
    %16 = vector.shape_cast %15 : vector<1x32x32xf32> to vector<32x32xf32>
    %cst_16 = arith.constant dense<0.000000e+00> : vector<64x32xf32>
    %17 = tpu.matmul %14, %16, %cst_16 {dimension_numbers = #tpu.dot_dimension_numbers<[1], [0], [0], [1], [0, 0, 1, 1], [], []>} : vector<64x32xf32>, vector<32x32xf32>, vector<64x32xf32> -> vector<64x32xf32>
    %cst_17 = arith.constant dense<0.000000e+00> : vector<64x32xf32>
    %18 = tpu.matmul %1, %17, %cst_17 {dimension_numbers = #tpu.dot_dimension_numbers<[1], [0], [0], [1], [0, 0, 1, 1], [], []>} : vector<64x64xf32>, vector<64x32xf32>, vector<64x32xf32> -> vector<64x32xf32>
    %19 = math.tanh %18 : vector<64x32xf32>
    %c1 = arith.constant 1 : index
    %c0_18 = arith.constant 0 : index
    %c0_19 = arith.constant 0 : index
    %20 = vector.load %arg8[%c1, %c0_18, %c0_19] : memref<3x32x32xf32, #tpu.memory_space<vmem>>, vector<1x32x32xf32>
    %21 = vector.shape_cast %20 : vector<1x32x32xf32> to vector<32x32xf32>
    %cst_20 = arith.constant dense<0.000000e+00> : vector<64x32xf32>
    %22 = tpu.matmul %19, %21, %cst_20 {dimension_numbers = #tpu.dot_dimension_numbers<[1], [0], [0], [1], [0, 0, 1, 1], [], []>} : vector<64x32xf32>, vector<32x32xf32>, vector<64x32xf32> -> vector<64x32xf32>
    %cst_21 = arith.constant dense<0.000000e+00> : vector<64x32xf32>
    %23 = tpu.matmul %1, %22, %cst_21 {dimension_numbers = #tpu.dot_dimension_numbers<[1], [0], [0], [1], [0, 0, 1, 1], [], []>} : vector<64x64xf32>, vector<64x32xf32>, vector<64x32xf32> -> vector<64x32xf32>
    %24 = math.tanh %23 : vector<64x32xf32>
    %c2 = arith.constant 2 : index
    %c0_22 = arith.constant 0 : index
    %c0_23 = arith.constant 0 : index
    %25 = vector.load %arg8[%c2, %c0_22, %c0_23] : memref<3x32x32xf32, #tpu.memory_space<vmem>>, vector<1x32x32xf32>
    %26 = vector.shape_cast %25 : vector<1x32x32xf32> to vector<32x32xf32>
    %cst_24 = arith.constant dense<0.000000e+00> : vector<64x32xf32>
    %27 = tpu.matmul %24, %26, %cst_24 {dimension_numbers = #tpu.dot_dimension_numbers<[1], [0], [0], [1], [0, 0, 1, 1], [], []>} : vector<64x32xf32>, vector<32x32xf32>, vector<64x32xf32> -> vector<64x32xf32>
    %cst_25 = arith.constant dense<0.000000e+00> : vector<64x32xf32>
    %28 = tpu.matmul %1, %27, %cst_25 {dimension_numbers = #tpu.dot_dimension_numbers<[1], [0], [0], [1], [0, 0, 1, 1], [], []>} : vector<64x64xf32>, vector<64x32xf32>, vector<64x32xf32> -> vector<64x32xf32>
    %29 = math.tanh %28 : vector<64x32xf32>
    %c0_26 = arith.constant 0 : index
    %c0_27 = arith.constant 0 : index
    %30 = vector.load %arg9[%c0_26, %c0_27] : memref<32x64xf32, #tpu.memory_space<vmem>>, vector<32x64xf32>
    %cst_28 = arith.constant dense<0.000000e+00> : vector<64x64xf32>
    %31 = tpu.matmul %29, %30, %cst_28 {dimension_numbers = #tpu.dot_dimension_numbers<[1], [0], [0], [1], [0, 0, 1, 1], [], []>} : vector<64x32xf32>, vector<32x64xf32>, vector<64x64xf32> -> vector<64x64xf32>
    %cst_29 = arith.constant dense<0.000000e+00> : vector<64x64xf32>
    %32 = tpu.matmul %1, %31, %cst_29 {dimension_numbers = #tpu.dot_dimension_numbers<[1], [0], [0], [1], [0, 0, 1, 1], [], []>} : vector<64x64xf32>, vector<64x64xf32>, vector<64x64xf32> -> vector<64x64xf32>
    %33 = math.tanh %32 : vector<64x64xf32>
    %c0_30 = arith.constant 0 : index
    %c0_31 = arith.constant 0 : index
    %34 = vector.load %arg10[%c0_30, %c0_31] : memref<8x64xf32, #tpu.memory_space<vmem>>, vector<8x64xf32>
    %cst_32 = arith.constant dense<0.000000e+00> : vector<8x64xf32>
    %35 = tpu.matmul %34, %33, %cst_32 {dimension_numbers = #tpu.dot_dimension_numbers<[1], [0], [0], [1], [0, 0, 1, 1], [], []>} : vector<8x64xf32>, vector<64x64xf32>, vector<8x64xf32> -> vector<8x64xf32>
    %36 = vector.extract_strided_slice %35 {offsets = [0, 0], sizes = [8, 32], strides = [1, 1]} : vector<8x64xf32> to vector<8x32xf32>
    %37 = vector.extract_strided_slice %35 {offsets = [0, 32], sizes = [8, 32], strides = [1, 1]} : vector<8x64xf32> to vector<8x32xf32>
    %c0_33 = arith.constant 0 : index
    %c0_34 = arith.constant 0 : index
    %38 = vector.load %arg3[%c0_33, %c0_34] : memref<8x32xf32, #tpu.memory_space<vmem>>, vector<8x32xf32>
    %cst_35 = arith.constant 5.000000e-01 : f32
    %39 = vector.broadcast %cst_35 : f32 to vector<8x32xf32>
    %40 = arith.mulf %39, %37 : vector<8x32xf32>
    %41 = math.exp %40 : vector<8x32xf32>
    %42 = arith.mulf %38, %41 : vector<8x32xf32>
    %43 = arith.addf %42, %36 : vector<8x32xf32>
    %cst_36 = arith.constant 0.000000e+00 : f32
    %44 = vector.broadcast %cst_36 : f32 to vector<8x32xf32>
    %45 = tpu.concatenate %43, %35, %44 in 1 : vector<8x32xf32>, vector<8x64xf32>, vector<8x32xf32> -> vector<8x128xf32>
    %c0_37 = arith.constant 0 : index
    %c0_38 = arith.constant 0 : index
    %46 = vector.load %arg11[%c0_37, %c0_38] : memref<8x128xf32, #tpu.memory_space<vmem>>, vector<8x128xf32>
    tpu.vector_store %arg11[%c0_37, %c0_38], %45 {strides = array<i32>} : memref<8x128xf32, #tpu.memory_space<vmem>>, vector<8x128xf32>,
    return
  }
  func.func @transform_0(%arg0: i32) -> (i32, i32, i32) {
    %c0_i32 = arith.constant 0 : i32
    %c0_i32_0 = arith.constant 0 : i32
    %c0_i32_1 = arith.constant 0 : i32
    return %arg0, %c0_i32, %c0_i32_0 : i32, i32, i32
  }
  func.func @transform_1(%arg0: i32) -> (i32, i32) {
    %c0_i32 = arith.constant 0 : i32
    %c0_i32_0 = arith.constant 0 : i32
    return %arg0, %c0_i32 : i32, i32
  }
  func.func @transform_2(%arg0: i32) -> (i32, i32) {
    %c0_i32 = arith.constant 0 : i32
    %c0_i32_0 = arith.constant 0 : i32
    return %arg0, %c0_i32 : i32, i32
  }
  func.func @transform_3(%arg0: i32) -> (i32, i32) {
    %c0_i32 = arith.constant 0 : i32
    %c0_i32_0 = arith.constant 0 : i32
    %c0_i32_1 = arith.constant 0 : i32
    return %c0_i32, %c0_i32_0 : i32, i32
  }
  func.func @transform_4(%arg0: i32) -> (i32, i32) {
    %c0_i32 = arith.constant 0 : i32
    %c0_i32_0 = arith.constant 0 : i32
    %c0_i32_1 = arith.constant 0 : i32
    return %c0_i32, %c0_i32_0 : i32, i32
  }
  func.func @transform_5(%arg0: i32) -> (i32, i32) {
    %c0_i32 = arith.constant 0 : i32
    %c0_i32_0 = arith.constant 0 : i32
    %c0_i32_1 = arith.constant 0 : i32
    return %c0_i32, %c0_i32_0 : i32, i32
  }
  func.func @transform_6(%arg0: i32) -> (i32, i32) {
    %c0_i32 = arith.constant 0 : i32
    %c0_i32_0 = arith.constant 0 : i32
    %c0_i32_1 = arith.constant 0 : i32
    return %c0_i32, %c0_i32_0 : i32, i32
  }
  func.func @transform_7(%arg0: i32) -> (i32, i32, i32) {
    %c0_i32 = arith.constant 0 : i32
    %c0_i32_0 = arith.constant 0 : i32
    %c0_i32_1 = arith.constant 0 : i32
    %c0_i32_2 = arith.constant 0 : i32
    return %c0_i32, %c0_i32_0, %c0_i32_1 : i32, i32, i32
  }
  func.func @transform_8(%arg0: i32) -> (i32, i32) {
    %c0_i32 = arith.constant 0 : i32
    %c0_i32_0 = arith.constant 0 : i32
    %c0_i32_1 = arith.constant 0 : i32
    return %c0_i32, %c0_i32_0 : i32, i32
  }
  func.func @transform_9(%arg0: i32) -> (i32, i32) {
    %c0_i32 = arith.constant 0 : i32
    %c0_i32_0 = arith.constant 0 : i32
    %c0_i32_1 = arith.constant 0 : i32
    return %c0_i32, %c0_i32_0 : i32, i32
  }
  func.func @transform_10(%arg0: i32) -> (i32, i32) {
    %c0_i32 = arith.constant 0 : i32
    %c0_i32_0 = arith.constant 0 : i32
    return %arg0, %c0_i32 : i32, i32
  }
}

</mosaic_0001>

<bundles_post_ra>
// kernel: tpu_custom_call.1
= control target key start
LH: loop header
LB: loop body
LE: loop exit
PB: predicated region body
PF: predicated region fallthrough
CT: control target
= control target key end

     0   :  { %s3302_s0 = inlined_call_operand.vmem [shape: f32[2,64,64], index: 0, kind: input, shape index: {}]   ;;  %s3303_s1 = inlined_call_operand.vmem [shape: f32[128,16], index: 1, kind: input, shape index: {}]   ;;  %s3304_s2 = inlined_call_operand.vmem [shape: f32[16,32], index: 2, kind: input, shape index: {}]   ;;  %s3305_s3 = inlined_call_operand.hbm [shape: f32[16,128], index: 3, kind: input, shape index: {}]   ;;  %s3306_s4 = inlined_call_operand.vmem [shape: f32[1,128], index: 4, kind: input, shape index: {}]   ;;  %s3307_s5 = inlined_call_operand.vmem [shape: f32[128,32], index: 5, kind: input, shape index: {}]   ;;  %s3308_s6 = inlined_call_operand.vmem [shape: f32[1,32], index: 6, kind: input, shape index: {}]   ;;  %s3309_s7 = inlined_call_operand.vmem [shape: f32[3,32,32], index: 7, kind: input, shape index: {}]   ;;  %s3310_s8 = inlined_call_operand.vmem [shape: f32[32,64], index: 8, kind: input, shape index: {}]   ;;  %s3311_s9 = inlined_call_operand.vmem [shape: f32[8,64], index: 9, kind: input, shape index: {}]   ;;  %s3312_s10 = inlined_call_operand.hbm [shape: f32[16,128], index: 10, kind: output, shape index: {}]  }
   0x1   :  { %3316 = sst [smem:[#allocation8_spill]] %s3302_s0 }
   0x2   :  { %15 = vsyncpa [#allocation3], 0 }
   0x3   :  { %16 = vsyncpa [#allocation4], 0 }
   0x4   :  { %18 = vsyncpa [#allocation4 + $0x1], 0  ;;  %s2909_s13 = smov 0   ;;  %s2911_s14 = smov 0  }
   0x5   :  { %s2913_s15 = smov 0   ;;  %s2915_s16 = smov 0  }
   0x6 LB: > { %s2930_s17 = sadd.s32 4294967295, %s2843_s16   ;;  %s1924_s18 = sadd.s32 4294967294, %s2843_s16   ;;  %s2843_s16 = sphi %s2915_s16, %s3330_s16   ;;  %s2839_s15 = sphi %s2913_s15, %s3329_s15   ;;  %s2835_s14 = sphi %s2911_s14, %s3328_s14   ;;  %s2831_s13 = sphi %s2909_s13, %s3327_s13  }
   0x7   : > { %s2934_s19 = sadd.s32 1, %s2843_s16   ;;  %s256_s20 = sadd.s32 1, %s2839_s15 }
   0x8   : > { %s253_s21 = ssub.s32 %s2843_s16, %s2934_s19  ;;  %p266_p0 = scmp.ne.s32.totalorder %s2839_s15, %s2835_s14 }
   0x9   : > { %p254_p1 = scmp.eq.s32.totalorder %s253_s21, 0  ;;  %p267_p2 = scmp.eq.s32.totalorder %s2930_s17, 1 }
   0xa   : > { %p272_p3 = scmp.ne.s32.totalorder %s2835_s14, %s2831_s13  ;;  %p273_p4 = scmp.eq.s32.totalorder %s1924_s18, 1 }
   0xb   : > { %s2945_s22 = scalar_select %p254_p1, %s2839_s15, %s256_s20  }
   0xc   : > { %p2947_p5 = por %p267_p2, %p266_p0  ;;  %p2951_p6 = por %p273_p4, %p272_p3 }
   0xd   : > { %p1925_p7 = scmp.ge.s32.totalorder %s2843_s16, 1  ;;  %p280_p8 = scmp.lt.s32.totalorder %s2843_s16, 3 }
   0xe   : > { %s3317_s23 = scalar_select %p2947_p5, 1, 0 }
   0xf   : > { %s3318_s24 = scalar_select %p2951_p6, 1, 0 }
  0x10   : > { %p3313_p9 = scmp.eq.s32.totalorder %s2930_s17, 0  ;;  %p2958_p10 = pnand %p1925_p7, %p280_p8 }
  0x11   : > { %s2845_s26 = smov [#allocation2]   ;;  %s2749_s11 = scalar_lea.hbm %s3305_s3, 256 }
  0x12   : > { %s3319_s25 = scalar_select %p2958_p10, 1, 0 }
  0x13   : > { %s292_s27 = sshll.u32 %s2845_s26, 4  ;;  %p2600_p11 = pneg %p2958_p10  ;;  %s293_s27 = int_to_ptr.vmem [resolvable:$true] %s292_s27 }
  0x14   : > { %p2750_p13 = scmp.ne.s32.totalorder %s3305_s3, %s2749_s11  ;;  %p2756_p3 = scmp.lt.u32.totalorder %s2749_s11, %s3305_s3 }
  0x15   : > { %p2966_p12 = pnand %p3313_p9, %p2600_p11 }
  0x17   : > { %p2751_p0 = pneg %p2966_p12 }
  0x19   : > { %p2752_p1 = pnand %p2751_p0, %p2750_p13 }
  0x1b   : > { %p2753_p2 = pneg %p2752_p1 }
  0x1d   : > { %p2758_p4 = pnand %p2756_p3, %p2753_p2 }
  0x1f   : > { %2761 = shalt.err (!%p2758_p4)
}
  0x20   : > { %s2762_s26 = scalar_lea.vmem %s293_s27, 256  ;;  %p2770_p9 = scmp.lt.s32.totalorder %s293_s27, %s293_s27 }
  0x21   : > { %p2763_p7 = scmp.ne.s32.totalorder %s293_s27, %s2762_s26  ;;  %p2771_p6 = scmp.lt.s32.totalorder %s2762_s26, %s2762_s26 }
  0x23   : > { %p2765_p8 = pnand %p2763_p7, %p2751_p0  ;;  %p2772_p5 = por %p2771_p6, %p2770_p9 }
  0x25   : > { %p2766_p11 = pneg %p2765_p8 }
  0x27   : > { %p2773_p10 = pnand %p2772_p5, %p2766_p11 }
  0x29   : > { %2776 = shalt.err (!%p2773_p10)
}
  0x2a   : > { %s2846_s29 = smov 128   ;;  %s2847_s30 = smov 8  }
  0x2b   : > { %2603 = dma.hbm_to_vmem [thread:$0]  (!%p2966_p12), %s3305_s3, 256, %s293_s27, [#allocation3], %s2846_s29, %s2846_s29, %s2847_s30  }
  0x2c   : > { %p3321_p13 = scmp.ne.s32.totalorder %s3319_s25, 0 }
  0x2d   : > { %p3322_p1 = scmp.eq.s32.totalorder (!%p3321_p13), %s2930_s17, 0 }
  0x2e   : > { %350 = sbr.rel (%p3321_p13) target bundleno = 2718 (0xa9e), region = 60 }
  0x35   : > { %2822 = dma.done.wait (%p3322_p1), [#allocation3], 256   ;;  %p3323_p0 = pmov %p3322_p1 }
  0x36   : > { %s1933_s11 = sshll.u32 %s2930_s17, 3  ;;  %vm437_vm0 = vcmask 130048   ;;  %v428_v0 = vld [vmem:[#allocation2] sm:$0xff]  ;;  %v429_v1 = vld [vmem:[#allocation2 + $0x8] sm:$0xff]  ;;  %v577_v8 = vld [vmem:[%s3307_s5 + $0x10] sm:$0xff]  ;;  %vm715_vm1 = vcmask 261120  }
  0x37   : > { %2824 = vsyncadd (%p3323_p0), [#allocation3], 4294967040  ;;  %p403_p5 = scmp.lt.s32.totalorder %s1933_s11, 15  ;;  %v2450_v3 = vpack.c.bf16 %v429_v1, %v428_v0  ;;  %v575_v4 = vld [vmem:[%s3307_s5] sm:$0xff]  ;;  %v576_v5 = vld [vmem:[%s3307_s5 + $0x8] sm:$0xff]  ;;  %p397_p6 = scmp.lt.s32.totalorder %s2930_s17, 1 }
  0x38   : > { %v2454_v7 = vpack.c.bf16 %v576_v5, %v575_v4  ;;  %v578_v9 = vld [vmem:[%s3307_s5 + $0x18] sm:$0xff]  ;;  %v579_v12 = vld [vmem:[%s3307_s5 + $0x20] sm:$0xff]  ;;  %v580_v13 = vld [vmem:[%s3307_s5 + $0x28] sm:$0xff]  ;;  %s3324_s0 = sld [smem:[#allocation8_spill]]  ;;  %vm845_vm2 = vcmask 523264   ;;  %vm2849_vm3 = vmmov 0  }
  0x39   : > { %s3332_s11 = smov (!%p403_p5, %s1933_s11), 15  ;;  %2451 = vmatprep.subr.bf16.mxu0 %v2450_v3  ;;  %v2458_v11 = vpack.c.bf16 %v578_v9, %v577_v8  ;;  %v2462_v15 = vpack.c.bf16 %v580_v13, %v579_v12  ;;  %v581_v17 = vld [vmem:[%s3307_s5 + $0x30] sm:$0xff]  ;;  %v582_v18 = vld [vmem:[%s3307_s5 + $0x38] sm:$0xff]  ;;  %v583_v23 = vld [vmem:[%s3307_s5 + $0x40] sm:$0xff]  ;;  %s2852_s30 = smov 32   ;;  %vm1812_vm4 = vcmask 785408  }
  0x3a   : > { %s1934_s20 = sshll.u32 %s3332_s11, 3  ;;  %2453 = vmatpush3.bf16.msra.mxu0 %v2450_v3  ;;  %2455 = vmatprep.subr.bf16.mxu1 %v2454_v7  ;;  %v2466_v20 = vpack.c.bf16 %v582_v18, %v581_v17  ;;  %v584_v24 = vld [vmem:[%s3307_s5 + $0x48] sm:$0xff]  ;;  %v585_v26 = vld [vmem:[%s3307_s5 + $0x50] sm:$0xff]  ;;  %v586_v27 = vld [vmem:[%s3307_s5 + $0x58] sm:$0xff]  ;;  %s2020_s25 = sshll.u32 %s2930_s17, 7 }
  0x3b   : > { %s2996_s26 = scalar_lea.vmem %s3303_s1, %s1934_s20  ;;  %2457 = vmatpush3.bf16.msra.mxu1 %v2454_v7  ;;  %v2470_v25 = vpack.c.bf16 %v584_v24, %v583_v23  ;;  %v2474_v28 = vpack.c.bf16 %v586_v27, %v585_v26  ;;  %v587_v29 = vld [vmem:[%s3307_s5 + $0x60] sm:$0xff]  ;;  %v588_v30 = vld [vmem:[%s3307_s5 + $0x68] sm:$0xff]  ;;  %v589_v32 = vld [vmem:[%s3307_s5 + $0x70] sm:$0xff]  ;;  %p3325_p10 = scmp.ne.s32.totalorder %s3317_s23, 0 }
  0x3c   : > { %v420_v2 = vld [vmem:[%s2996_s26] sm:$0xff]  ;;  %v421_v6 = vld [vmem:[%s2996_s26 + $0x8] sm:$0xff]  ;;  %v422_v10 = vld [vmem:[%s2996_s26 + $0x10] sm:$0xff]  ;;  %2459 = vmatprep.subr.bf16.mxu1 %v2458_v11  ;;  %v2478_v31 = vpack.c.bf16 %v588_v30, %v587_v29  ;;  %s2853_s11 = smov [#allocation5]  }
  0x3d   : > { %2183 = vmatprep.mubr.msk.f32.mxu0 %vm437_vm0, %v420_v2  ;;  %v423_v14 = vld [vmem:[%s2996_s26 + $0x18] sm:$0xff]  ;;  %v424_v16 = vld [vmem:[%s2996_s26 + $0x20] sm:$0xff]  ;;  %v425_v19 = vld [vmem:[%s2996_s26 + $0x28] sm:$0xff]  ;;  %s2781_s20 = sshll.u32 %s2853_s11, 4  ;;  %s2782_s20 = int_to_ptr.vmem [resolvable:$false] %s2781_s20 }
  0x3e   : > { %2184 = vmatmul.mubr.msk.f32.vlgmr.msra.gmra.mrb[0].mxu0 %vm437_vm0, %v421_v6  ;;  %v426_v21 = vld [vmem:[%s2996_s26 + $0x30] sm:$0xff]  ;;  %v427_v22 = vld [vmem:[%s2996_s26 + $0x38] sm:$0xff]  ;;  %v1936_v35 = vld [vmem:[%s3306_s4] ss:$0 sm:$0xff]  ;;  %s3090_s26 = scalar_select %p397_p6, %s2930_s17, 1 }
  0x3f   : > { %2186 = vmatprep.mubr.msk.f32.mxu0 %vm437_vm0, %v422_v10  ;;  %2461 = vmatpush3.bf16.msra.mxu1 %v2458_v11  ;;  %v590_v33 = vld [vmem:[%s3307_s5 + $0x78] sm:$0xff]  ;;  %v711_v60 = vld [vmem:[%s3309_s7] sm:$0xff]  ;;  %v712_v61 = vld [vmem:[%s3309_s7 + $0x8] sm:$0xff] }
  0x40   : > { %2463 = vmatprep.subr.bf16.mxu1 %v2462_v15  ;;  %v2482_v34 = vpack.c.bf16 %v590_v33, %v589_v32  ;;  %v2486_v62 = vpack.c.bf16 %v712_v61, %v711_v60  ;;  %v713_v63 = vld [vmem:[%s3309_s7 + $0x10] sm:$0xff]  ;;  %v714_v0 = vld [vmem:[%s3309_s7 + $0x18] sm:$0xff]  ;;  %v1945_v2 = vld [vmem:[%s3308_s6] ss:$0 sm:$0xff]  ;;  %s2023_s29 = sshll.u32 %s3090_s26, 6  ;;  %s1935_s12 = sshll.u32 %s3090_s26, 3 }
  0x41   : > { %v2490_v1 = vpack.c.bf16 %v714_v0, %v713_v63  ;;  %s3096_s18 = scalar_lea.vmem %s3324_s0, %s2023_s29  ;;  %v1963_v29 = vld [vmem:[%s3309_s7 + $0x28] sm:$0xff]  ;;  %s2851_s29 = smov 96  }
  0x42   : > { %2187 = vmatmul.mubr.msk.f32.gmra.mrb[2].mxu0 %vm437_vm0, %v423_v14  ;;  %2487 = vmatprep.subr.bf16.mxu0 %v2486_v62  ;;  %v3099_v27 = vld [vmem:[%s3096_s18] sm:$0xff]  ;;  %s411_s28 = scalar_lea.vmem %s3304_s2, %s1935_s12 }
  0x43   : > { %2189 = vmatprep.mubr.msk.f32.mxu0 %vm437_vm0, %v424_v16  ;;  %2465 = vmatpush3.bf16.msra.mxu1 %v2462_v15 }
  0x44   : > { %2467 = vmatprep.subr.bf16.mxu1 %v2466_v20  ;;  %2489 = vmatpush3.bf16.msra.mxu0 %v2486_v62 }
  0x45   : > { %2491 = vmatprep.subr.bf16.mxu0 %v2490_v1 }
  0x46   : > { %2190 = vmatmul.mubr.msk.f32.gmra.mrb[4].mxu0 %vm437_vm0, %v425_v19 }
  0x47   : > { %2192 = vmatprep.mubr.msk.f32.mxu0 %vm437_vm0, %v426_v21  ;;  %2469 = vmatpush3.bf16.msra.mxu1 %v2466_v20 }
  0x48   : > { %2471 = vmatprep.subr.bf16.mxu1 %v2470_v25  ;;  %2493 = vmatpush3.bf16.msra.mxu0 %v2490_v1 }
  0x4a   : > { %2193 = vmatmul.mubr.msk.f32.gmra.mrb[6].mxu0 %vm437_vm0, %v427_v22 }
  0x4b   : > { %2473 = vmatpush3.bf16.msra.mxu1 %v2470_v25 }
  0x4c   : > { %2475 = vmatprep.subr.bf16.mxu1 %v2474_v28 }
  0x4f   : > { %2477 = vmatpush3.bf16.msra.mxu1 %v2474_v28  ;;  %v1962_v28 = vld [vmem:[%s3309_s7 + $0x20] sm:$0xff] }
  0x50   : > { %2479 = vmatprep.subr.bf16.mxu1 %v2478_v31  ;;  %v2510_v30 = vpack.c.bf16 %v1963_v29, %v1962_v28 }
  0x53   : > { %2481 = vmatpush3.bf16.msra.mxu1 %v2478_v31 }
  0x54   : > { %2483 = vmatprep.subr.bf16.mxu1 %v2482_v34 }
  0x57   : > { %2485 = vmatpush3.bf16.msra.mxu1 %v2482_v34 }
  0x58   : > { %2511 = vmatprep.subr.bf16.mxu1 %v2510_v30 }
 0x111   : > { %v2185_v36 = vpop.f32.mrb[0].mxu0 }
 0x112   : > { %v534_v37 = vadd.f32 %v2185_v36, %v1936_v35  ;;  %v528_v38 = vpop.f32.mrb[1].mxu0 }
 0x113   : > { %v529_v39 = vadd.f32 %v1936_v35, %v528_v38 }
 0x115   : > { %2651 = vtanh.f32 %v529_v39  ;;  %v2188_v40 = vpop.f32.mrb[2].mxu0 }
 0x116   : > { %2653 = vtanh.f32 %v534_v37  ;;  %v544_v41 = vadd.f32 %v2188_v40, %v1936_v35  ;;  %v538_v42 = vpop.f32.mrb[3].mxu0 }
 0x117   : > { %v539_v43 = vadd.f32 %v1936_v35, %v538_v42 }
 0x119   : > { %2655 = vtanh.f32 %v539_v43  ;;  %v2191_v44 = vpop.f32.mrb[4].mxu0  ;;  %v3110_v43 = vld [vmem:[%s3096_s18 + $0x8] sm:$0xff] }
 0x11a   : > { %2657 = vtanh.f32 %v544_v41  ;;  %v554_v45 = vadd.f32 %v2191_v44, %v1936_v35  ;;  %v548_v46 = vpop.f32.mrb[5].mxu0  ;;  %v3113_v44 = vld [vmem:[%s3096_s18 + $0x10] sm:$0xff] }
 0x11b   : > { %v549_v47 = vadd.f32 %v1936_v35, %v548_v46  ;;  %v3123_v46 = vld [vmem:[%s3096_s18 + $0x20] sm:$0xff] }
 0x11d   : > { %2659 = vtanh.f32 %v549_v47  ;;  %v2194_v48 = vpop.f32.mrb[6].mxu0  ;;  %v3130_v47 = vld [vmem:[%s3096_s18 + $0x28] sm:$0xff] }
 0x11e   : > { %2661 = vtanh.f32 %v554_v45  ;;  %v564_v49 = vadd.f32 %v2194_v48, %v1936_v35  ;;  %v558_v50 = vpop.f32.mrb[7].mxu0  ;;  %v3120_v45 = vld [vmem:[%s3096_s18 + $0x18] sm:$0xff]  ;;  %v3133_v48 = vld [vmem:[%s3096_s18 + $0x30] sm:$0xff] }
 0x11f   : > { %v2652_v51 = vpop.eup %2651  ;;  %v559_v52 = vadd.f32 %v1936_v35, %v558_v50  ;;  %v1964_v50 = vld [vmem:[%s3309_s7 + $0x30] sm:$0xff] }
 0x120   : > { %v2654_v53 = vpop.eup %2653  ;;  %2227 = vmatprep.mubr.f32.mxu1 %v2652_v51  ;;  %v1965_v51 = vld [vmem:[%s3309_s7 + $0x38] sm:$0xff] }
 0x121   : > { %2663 = vtanh.f32 %v559_v52  ;;  %2228 = vmatmul.mubr.f32.vlgmr.msra.gmra.mrb[0].mxu1 %v2654_v53  ;;  %v2514_v52 = vpack.c.bf16 %v1965_v51, %v1964_v50 }
 0x122   : > { %2665 = vtanh.f32 %v564_v49  ;;  %2513 = vmatpush3.bf16.msra.mxu1 %v2510_v30  ;;  %v3140_v49 = vld [vmem:[%s3096_s18 + $0x38] sm:$0xff]  ;;  %s394_s18 = sand.u32 1, %s2835_s14  }
 0x123   : > { %v2656_v54 = vpop.eup %2655  ;;  %2515 = vmatprep.subr.bf16.mxu1 %v2514_v52  ;;  %s1930_s21 = sshll.u32 %s394_s18, 3  ;;  %s1816_s17 = scalar_lea.sflag [#allocation4], %s394_s18 }
 0x124   : > { %v2658_v55 = vpop.eup %2657  ;;  %2230 = vmatprep.mubr.f32.mxu1 %v2656_v54  ;;  %s396_s27 = scalar_lea.vmem [#allocation5], %s1930_s21 }
 0x125   : > { %2231 = vmatmul.mubr.f32.gmra.mrb[2].mxu1 %v2658_v55  ;;  %s1829_s0 = sshll.u32 %s396_s27, 4  ;;  %s3262_s0 = int_to_ptr.vmem [resolvable:$true] %s1829_s0 }
 0x126   : > { %2517 = vmatpush3.bf16.msra.mxu1 %v2514_v52  ;;  %s2777_s12 = scalar_lea.vmem %s3262_s0, 128  ;;  %p2784_p3 = scmp.lt.s32.totalorder %s3262_s0, %s2782_s20 }
 0x127   : > { %v2660_v56 = vpop.eup %2659  ;;  %p2778_p9 = scmp.ne.s32.totalorder %s3262_s0, %s2777_s12 }
 0x128   : > { %v2662_v57 = vpop.eup %2661  ;;  %2233 = vmatprep.mubr.f32.mxu1 %v2660_v56 }
 0x129   : > { %2234 = vmatmul.mubr.f32.gmra.mrb[4].mxu1 %v2662_v57  ;;  %p2779_p12 = pnand %p2778_p9, %p3325_p10 }
 0x12b   : > { %v2664_v58 = vpop.eup %2663  ;;  %p2780_p2 = pneg %p2779_p12 }
 0x12c   : > { %v2666_v59 = vpop.eup %2665  ;;  %2236 = vmatprep.mubr.f32.mxu1 %v2664_v58 }
 0x12d   : > { %2237 = vmatmul.mubr.f32.gmra.mrb[6].mxu1 %v2666_v59 }
 0x1f4   : > { %v2229_v3 = vpop.f32.mrb[0].mxu1 }
 0x1f5   : > { %v670_v4 = vadd.f32 %v2229_v3, %v1945_v2  ;;  %v664_v5 = vpop.f32.mrb[1].mxu1 }
 0x1f6   : > { %v665_v6 = vadd.f32 %v1945_v2, %v664_v5  ;;  %v1982_v5 = vld [vmem:[%s3309_s7 + $0x40] sm:$0xff] }
 0x1f8   : > { %2667 = vtanh.f32 %v665_v6  ;;  %v2232_v7 = vpop.f32.mrb[2].mxu1  ;;  %v1983_v6 = vld [vmem:[%s3309_s7 + $0x48] sm:$0xff] }
 0x1f9   : > { %2669 = vtanh.f32 %v670_v4  ;;  %v680_v8 = vadd.f32 %v2232_v7, %v1945_v2  ;;  %v674_v9 = vpop.f32.mrb[3].mxu1  ;;  %v2534_v7 = vpack.c.bf16 %v1983_v6, %v1982_v5 }
 0x1fa   : > { %v675_v10 = vadd.f32 %v1945_v2, %v674_v9 }
 0x1fb   : > { %2535 = vmatprep.subr.bf16.mxu1 %v2534_v7 }
 0x1fc   : > { %2671 = vtanh.f32 %v675_v10  ;;  %v2235_v11 = vpop.f32.mrb[4].mxu1 }
 0x1fd   : > { %2673 = vtanh.f32 %v680_v8  ;;  %v690_v12 = vadd.f32 %v2235_v11, %v1945_v2  ;;  %v684_v13 = vpop.f32.mrb[5].mxu1 }
 0x1fe   : > { %v685_v14 = vadd.f32 %v1945_v2, %v684_v13 }
 0x200   : > { %2675 = vtanh.f32 %v685_v14  ;;  %v2238_v15 = vpop.f32.mrb[6].mxu1 }
 0x201   : > { %2677 = vtanh.f32 %v690_v12  ;;  %v700_v16 = vadd.f32 %v2238_v15, %v1945_v2  ;;  %v694_v17 = vpop.f32.mrb[7].mxu1 }
 0x202   : > { %v2668_v18 = vpop.eup %2667  ;;  %v695_v19 = vadd.f32 %v1945_v2, %v694_v17 }
 0x203   : > { %v2670_v20 = vpop.eup %2669  ;;  %2247 = vmatprep.mubr.msk.f32.mxu0 %vm715_vm1, %v2668_v18 }
 0x204   : > { %2679 = vtanh.f32 %v695_v19  ;;  %2248 = vmatmul.mubr.msk.f32.vlgmr.msra.gmra.mrb[8].mxu0 %vm715_vm1, %v2670_v20  ;;  %v1984_v20 = vld [vmem:[%s3309_s7 + $0x50] sm:$0xff] }
 0x205   : > { %2681 = vtanh.f32 %v700_v16 }
 0x206   : > { %v2672_v21 = vpop.eup %2671 }
 0x207   : > { %v2674_v22 = vpop.eup %2673  ;;  %2250 = vmatprep.mubr.msk.f32.mxu0 %vm715_vm1, %v2672_v21  ;;  %v1985_v21 = vld [vmem:[%s3309_s7 + $0x58] sm:$0xff] }
 0x208   : > { %2251 = vmatmul.mubr.msk.f32.gmra.mrb[10].mxu0 %vm715_vm1, %v2674_v22  ;;  %v2538_v22 = vpack.c.bf16 %v1985_v21, %v1984_v20 }
 0x20a   : > { %v2676_v23 = vpop.eup %2675 }
 0x20b   : > { %v2678_v24 = vpop.eup %2677  ;;  %2253 = vmatprep.mubr.msk.f32.mxu0 %vm715_vm1, %v2676_v23 }
 0x20c   : > { %2254 = vmatmul.mubr.msk.f32.gmra.mrb[12].mxu0 %vm715_vm1, %v2678_v24 }
 0x20e   : > { %v2680_v25 = vpop.eup %2679 }
 0x20f   : > { %v2682_v26 = vpop.eup %2681  ;;  %2256 = vmatprep.mubr.msk.f32.mxu0 %vm715_vm1, %v2680_v25 }
 0x210   : > { %2257 = vmatmul.mubr.msk.f32.gmra.mrb[14].mxu0 %vm715_vm1, %v2682_v26 }
 0x211   : > { %2275 = vmatprep.mubr.msk.f32.mxu0 %vm845_vm2, %v3099_v27 }
 0x2d7   : > { %v2249_v31 = vpop.f32.mrb[8].mxu0 }
 0x2d8   : > { %v806_v32 = vpop.f32.mrb[9].mxu0 }
 0x2d9   : > { %v2494_v33 = vpack.c.bf16 %v2249_v31, %v806_v32 }
 0x2db   : > { %v2252_v34 = vpop.f32.mrb[10].mxu0  ;;  %2495 = vmatprep.subr.bf16.mxu0 %v2494_v33 }
 0x2dc   : > { %v816_v35 = vpop.f32.mrb[11].mxu0  ;;  %2497 = vmatpush3.bf16.msra.mxu0 %v2494_v33 }
 0x2dd   : > { %v2498_v36 = vpack.c.bf16 %v2252_v34, %v816_v35 }
 0x2df   : > { %v2255_v37 = vpop.f32.mrb[12].mxu0  ;;  %2499 = vmatprep.subr.bf16.mxu0 %v2498_v36 }
 0x2e0   : > { %v826_v38 = vpop.f32.mrb[13].mxu0  ;;  %2501 = vmatpush3.bf16.msra.mxu0 %v2498_v36 }
 0x2e1   : > { %v2502_v39 = vpack.c.bf16 %v2255_v37, %v826_v38 }
 0x2e3   : > { %v2258_v40 = vpop.f32.mrb[14].mxu0  ;;  %2503 = vmatprep.subr.bf16.mxu0 %v2502_v39 }
 0x2e4   : > { %v836_v41 = vpop.f32.mrb[15].mxu0  ;;  %2505 = vmatpush3.bf16.msra.mxu0 %v2502_v39 }
 0x2e5   : > { %v2506_v42 = vpack.c.bf16 %v2258_v40, %v836_v41  ;;  %v1477_v40 = vld [vmem:[%s3310_s8] sm:$0xff]  ;;  %v1478_v41 = vld [vmem:[%s3310_s8 + $0x8] sm:$0xff] }
 0x2e7   : > { %2507 = vmatprep.subr.bf16.mxu0 %v2506_v42 }
 0x2e8   : > { %2509 = vmatpush3.bf16.msra.mxu0 %v2506_v42  ;;  %v2558_v42 = vpack.c.bf16 %v1478_v41, %v1477_v40 }
 0x2eb   : > { %2276 = vmatmul.mubr.msk.f32.vlgmr.msra.gmra.mrb[16].mxu0 %vm845_vm2, %v3110_v43 }
 0x2ec   : > { %2278 = vmatprep.mubr.msk.f32.mxu0 %vm845_vm2, %v3113_v44 }
 0x2ef   : > { %2279 = vmatmul.mubr.msk.f32.gmra.mrb[18].mxu0 %vm845_vm2, %v3120_v45 }
 0x2f0   : > { %2281 = vmatprep.mubr.msk.f32.mxu0 %vm845_vm2, %v3123_v46 }
 0x2f3   : > { %2282 = vmatmul.mubr.msk.f32.gmra.mrb[20].mxu0 %vm845_vm2, %v3130_v47 }
 0x2f4   : > { %2284 = vmatprep.mubr.msk.f32.mxu0 %vm845_vm2, %v3133_v48 }
 0x2f7   : > { %2285 = vmatmul.mubr.msk.f32.gmra.mrb[22].mxu0 %vm845_vm2, %v3140_v49 }
 0x2f8   : > { %2323 = vmatprep.mubr.msk.f32.mxu0 %vm845_vm2, %v3099_v27 }
 0x3be   : > { %v2277_v53 = vpop.f32.mrb[16].mxu0 }
 0x3bf   : > { %v936_v54 = vpop.f32.mrb[17].mxu0 }
 0x3c0   : > { %2683 = vtanh.f32 %v936_v54 }
 0x3c1   : > { %2685 = vtanh.f32 %v2277_v53 }
 0x3c2   : > { %v2280_v55 = vpop.f32.mrb[18].mxu0 }
 0x3c3   : > { %v946_v56 = vpop.f32.mrb[19].mxu0 }
 0x3c4   : > { %2687 = vtanh.f32 %v946_v56 }
 0x3c5   : > { %2689 = vtanh.f32 %v2280_v55 }
 0x3c6   : > { %v2283_v57 = vpop.f32.mrb[20].mxu0 }
 0x3c7   : > { %v956_v58 = vpop.f32.mrb[21].mxu0 }
 0x3c8   : > { %2691 = vtanh.f32 %v956_v58 }
 0x3c9   : > { %2693 = vtanh.f32 %v2283_v57 }
 0x3ca   : > { %v2684_v59 = vpop.eup %2683  ;;  %v2286_v60 = vpop.f32.mrb[22].mxu0 }
 0x3cb   : > { %v2686_v61 = vpop.eup %2685  ;;  %v966_v62 = vpop.f32.mrb[23].mxu0  ;;  %2295 = vmatprep.mubr.msk.f32.mxu1 %vm715_vm1, %v2684_v59 }
 0x3cc   : > { %2695 = vtanh.f32 %v966_v62  ;;  %2296 = vmatmul.mubr.msk.f32.vlgmr.msra.gmra.mrb[8].mxu1 %vm715_vm1, %v2686_v61  ;;  %v1479_v62 = vld [vmem:[%s3310_s8 + $0x10] sm:$0xff] }
 0x3cd   : > { %2697 = vtanh.f32 %v2286_v60  ;;  %2537 = vmatpush3.bf16.msra.mxu1 %v2534_v7 }
 0x3ce   : > { %v2688_v63 = vpop.eup %2687  ;;  %2539 = vmatprep.subr.bf16.mxu1 %v2538_v22 }
 0x3cf   : > { %v2690_v0 = vpop.eup %2689  ;;  %2298 = vmatprep.mubr.msk.f32.mxu1 %vm715_vm1, %v2688_v63  ;;  %v1480_v63 = vld [vmem:[%s3310_s8 + $0x18] sm:$0xff] }
 0x3d0   : > { %2299 = vmatmul.mubr.msk.f32.gmra.mrb[10].mxu1 %vm715_vm1, %v2690_v0  ;;  %v2562_v0 = vpack.c.bf16 %v1480_v63, %v1479_v62 }
 0x3d1   : > { %2541 = vmatpush3.bf16.msra.mxu1 %v2538_v22 }
 0x3d2   : > { %v2692_v1 = vpop.eup %2691  ;;  %2559 = vmatprep.subr.bf16.mxu1 %v2558_v42 }
 0x3d3   : > { %v2694_v2 = vpop.eup %2693  ;;  %2301 = vmatprep.mubr.msk.f32.mxu1 %vm715_vm1, %v2692_v1 }
 0x3d4   : > { %2302 = vmatmul.mubr.msk.f32.gmra.mrb[12].mxu1 %vm715_vm1, %v2694_v2 }
 0x3d6   : > { %v2696_v3 = vpop.eup %2695 }
 0x3d7   : > { %v2698_v4 = vpop.eup %2697  ;;  %2304 = vmatprep.mubr.msk.f32.mxu1 %vm715_vm1, %v2696_v3 }
 0x3d8   : > { %2305 = vmatmul.mubr.msk.f32.gmra.mrb[14].mxu1 %vm715_vm1, %v2698_v4 }
 0x49f   : > { %v2297_v8 = vpop.f32.mrb[8].mxu1 }
 0x4a0   : > { %v1078_v9 = vpop.f32.mrb[9].mxu1 }
 0x4a1   : > { %v2518_v10 = vpack.c.bf16 %v2297_v8, %v1078_v9 }
 0x4a3   : > { %v2300_v11 = vpop.f32.mrb[10].mxu1  ;;  %2519 = vmatprep.subr.bf16.mxu0 %v2518_v10 }
 0x4a4   : > { %v1088_v12 = vpop.f32.mrb[11].mxu1  ;;  %2521 = vmatpush3.bf16.msra.mxu0 %v2518_v10 }
 0x4a5   : > { %v2522_v13 = vpack.c.bf16 %v2300_v11, %v1088_v12 }
 0x4a7   : > { %v2303_v14 = vpop.f32.mrb[12].mxu1  ;;  %2523 = vmatprep.subr.bf16.mxu0 %v2522_v13 }
 0x4a8   : > { %v1098_v15 = vpop.f32.mrb[13].mxu1  ;;  %2525 = vmatpush3.bf16.msra.mxu0 %v2522_v13 }
 0x4a9   : > { %v2526_v16 = vpack.c.bf16 %v2303_v14, %v1098_v15 }
 0x4ab   : > { %v2306_v17 = vpop.f32.mrb[14].mxu1  ;;  %2527 = vmatprep.subr.bf16.mxu0 %v2526_v16 }
 0x4ac   : > { %v1108_v18 = vpop.f32.mrb[15].mxu1  ;;  %2529 = vmatpush3.bf16.msra.mxu0 %v2526_v16 }
 0x4ad   : > { %v2530_v19 = vpack.c.bf16 %v2306_v17, %v1108_v18 }
 0x4af   : > { %2531 = vmatprep.subr.bf16.mxu0 %v2530_v19 }
 0x4b0   : > { %2533 = vmatpush3.bf16.msra.mxu0 %v2530_v19 }
 0x4b3   : > { %2324 = vmatmul.mubr.msk.f32.vlgmr.msra.gmra.mrb[24].mxu0 %vm845_vm2, %v3110_v43 }
 0x4b4   : > { %2326 = vmatprep.mubr.msk.f32.mxu0 %vm845_vm2, %v3113_v44 }
 0x4b7   : > { %2327 = vmatmul.mubr.msk.f32.gmra.mrb[26].mxu0 %vm845_vm2, %v3120_v45 }
 0x4b8   : > { %2329 = vmatprep.mubr.msk.f32.mxu0 %vm845_vm2, %v3123_v46 }
 0x4bb   : > { %2330 = vmatmul.mubr.msk.f32.gmra.mrb[28].mxu0 %vm845_vm2, %v3130_v47 }
 0x4bc   : > { %2332 = vmatprep.mubr.msk.f32.mxu0 %vm845_vm2, %v3133_v48 }
 0x4bf   : > { %2333 = vmatmul.mubr.msk.f32.gmra.mrb[30].mxu0 %vm845_vm2, %v3140_v49 }
 0x4c0   : > { %2371 = vmatprep.mubr.msk.f32.mxu0 %vm845_vm2, %v3099_v27 }
 0x586   : > { %v2325_v23 = vpop.f32.mrb[24].mxu0 }
 0x587   : > { %v1183_v24 = vpop.f32.mrb[25].mxu0 }
 0x588   : > { %2699 = vtanh.f32 %v1183_v24 }
 0x589   : > { %2701 = vtanh.f32 %v2325_v23 }
 0x58a   : > { %v2328_v25 = vpop.f32.mrb[26].mxu0 }
 0x58b   : > { %v1193_v26 = vpop.f32.mrb[27].mxu0 }
 0x58c   : > { %2703 = vtanh.f32 %v1193_v26 }
 0x58d   : > { %2705 = vtanh.f32 %v2328_v25 }
 0x58e   : > { %v2331_v28 = vpop.f32.mrb[28].mxu0 }
 0x58f   : > { %v1203_v29 = vpop.f32.mrb[29].mxu0 }
 0x590   : > { %2707 = vtanh.f32 %v1203_v29  ;;  %v2848_v29 = vmov 0.0|0.0  }
 0x591   : > { %2709 = vtanh.f32 %v2331_v28 }
 0x592   : > { %v2700_v30 = vpop.eup %2699  ;;  %v2334_v31 = vpop.f32.mrb[30].mxu0 }
 0x593   : > { %v2702_v32 = vpop.eup %2701  ;;  %v1213_v33 = vpop.f32.mrb[31].mxu0  ;;  %2343 = vmatprep.mubr.msk.f32.mxu1 %vm715_vm1, %v2700_v30 }
 0x594   : > { %2711 = vtanh.f32 %v1213_v33  ;;  %2344 = vmatmul.mubr.msk.f32.vlgmr.msra.gmra.mrb[16].mxu1 %vm715_vm1, %v2702_v32 }
 0x595   : > { %2713 = vtanh.f32 %v2334_v31  ;;  %2561 = vmatpush3.bf16.msra.mxu1 %v2558_v42 }
 0x596   : > { %v2704_v34 = vpop.eup %2703  ;;  %2563 = vmatprep.subr.bf16.mxu1 %v2562_v0 }
 0x597   : > { %v2706_v35 = vpop.eup %2705  ;;  %2346 = vmatprep.mubr.msk.f32.mxu1 %vm715_vm1, %v2704_v34 }
 0x598   : > { %2347 = vmatmul.mubr.msk.f32.gmra.mrb[18].mxu1 %vm715_vm1, %v2706_v35 }
 0x599   : > { %2565 = vmatpush3.bf16.msra.mxu1 %v2562_v0 }
 0x59a   : > { %v2708_v36 = vpop.eup %2707  ;;  %2582 = vmatprep.subr.bf16.mxu1 %v2848_v29 }
 0x59b   : > { %v2710_v37 = vpop.eup %2709  ;;  %2349 = vmatprep.mubr.msk.f32.mxu1 %vm715_vm1, %v2708_v36 }
 0x59c   : > { %2350 = vmatmul.mubr.msk.f32.gmra.mrb[20].mxu1 %vm715_vm1, %v2710_v37 }
 0x59e   : > { %v2712_v38 = vpop.eup %2711 }
 0x59f   : > { %v2714_v39 = vpop.eup %2713  ;;  %2352 = vmatprep.mubr.msk.f32.mxu1 %vm715_vm1, %v2712_v38 }
 0x5a0   : > { %2353 = vmatmul.mubr.msk.f32.gmra.mrb[22].mxu1 %vm715_vm1, %v2714_v39 }
 0x667   : > { %v2345_v50 = vpop.f32.mrb[16].mxu1 }
 0x668   : > { %v1325_v51 = vpop.f32.mrb[17].mxu1 }
 0x669   : > { %v2542_v52 = vpack.c.bf16 %v2345_v50, %v1325_v51  ;;  %v1723_v51 = vld [vmem:[%s3311_s9] sm:$0xff] }
 0x66b   : > { %v2348_v53 = vpop.f32.mrb[18].mxu1  ;;  %2543 = vmatprep.subr.bf16.mxu0 %v2542_v52 }
 0x66c   : > { %v1335_v54 = vpop.f32.mrb[19].mxu1  ;;  %2545 = vmatpush3.bf16.msra.mxu0 %v2542_v52 }
 0x66d   : > { %v2546_v55 = vpack.c.bf16 %v2348_v53, %v1335_v54 }
 0x66f   : > { %v2351_v56 = vpop.f32.mrb[20].mxu1  ;;  %2547 = vmatprep.subr.bf16.mxu0 %v2546_v55 }
 0x670   : > { %v1345_v57 = vpop.f32.mrb[21].mxu1  ;;  %2549 = vmatpush3.bf16.msra.mxu0 %v2546_v55 }
 0x671   : > { %v2550_v58 = vpack.c.bf16 %v2351_v56, %v1345_v57  ;;  %v1797_v57 = vld [vmem:[%s411_s28] sm:$0xff]  ;;  %s2783_s28 = scalar_lea.vmem %s2782_s20, 256 }
 0x672   : > { %p2785_p4 = scmp.lt.s32.totalorder %s2783_s28, %s2777_s12 }
 0x673   : > { %v2354_v59 = vpop.f32.mrb[22].mxu1  ;;  %2551 = vmatprep.subr.bf16.mxu0 %v2550_v58 }
 0x674   : > { %v1355_v60 = vpop.f32.mrb[23].mxu1  ;;  %2553 = vmatpush3.bf16.msra.mxu0 %v2550_v58  ;;  %p2786_p7 = por %p2785_p4, %p2784_p3 }
 0x675   : > { %v2554_v61 = vpack.c.bf16 %v2354_v59, %v1355_v60 }
 0x676   : > { %p2787_p8 = pnand %p2786_p7, %p2780_p2 }
 0x677   : > { %2555 = vmatprep.subr.bf16.mxu0 %v2554_v61 }
 0x678   : > { %2557 = vmatpush3.bf16.msra.mxu0 %v2554_v61 }
 0x67b   : > { %2372 = vmatmul.mubr.msk.f32.vlgmr.msra.gmra.mrb[32].mxu0 %vm845_vm2, %v3110_v43 }
 0x67c   : > { %2374 = vmatprep.mubr.msk.f32.mxu0 %vm845_vm2, %v3113_v44 }
 0x67f   : > { %2375 = vmatmul.mubr.msk.f32.gmra.mrb[34].mxu0 %vm845_vm2, %v3120_v45 }
 0x680   : > { %2377 = vmatprep.mubr.msk.f32.mxu0 %vm845_vm2, %v3123_v46 }
 0x683   : > { %2378 = vmatmul.mubr.msk.f32.gmra.mrb[36].mxu0 %vm845_vm2, %v3130_v47 }
 0x684   : > { %2380 = vmatprep.mubr.msk.f32.mxu0 %vm845_vm2, %v3133_v48 }
 0x687   : > { %2381 = vmatmul.mubr.msk.f32.gmra.mrb[38].mxu0 %vm845_vm2, %v3140_v49 }
 0x688   : > { %2419 = vmatprep.mubr.msk.f32.mxu0 %vm845_vm2, %v3099_v27 }
 0x74e   : > { %v2373_v1 = vpop.f32.mrb[32].mxu0 }
 0x74f   : > { %v1430_v2 = vpop.f32.mrb[33].mxu0 }
 0x750   : > { %2715 = vtanh.f32 %v1430_v2 }
 0x751   : > { %2717 = vtanh.f32 %v2373_v1 }
 0x752   : > { %v2376_v3 = vpop.f32.mrb[34].mxu0 }
 0x753   : > { %v1440_v4 = vpop.f32.mrb[35].mxu0 }
 0x754   : > { %2719 = vtanh.f32 %v1440_v4 }
 0x755   : > { %2721 = vtanh.f32 %v2376_v3 }
 0x756   : > { %v2379_v27 = vpop.f32.mrb[36].mxu0 }
 0x757   : > { %v1450_v5 = vpop.f32.mrb[37].mxu0 }
 0x758   : > { %2723 = vtanh.f32 %v1450_v5 }
 0x759   : > { %2725 = vtanh.f32 %v2379_v27 }
 0x75a   : > { %v2716_v6 = vpop.eup %2715  ;;  %v2382_v7 = vpop.f32.mrb[38].mxu0 }
 0x75b   : > { %v2718_v8 = vpop.eup %2717  ;;  %v1460_v9 = vpop.f32.mrb[39].mxu0  ;;  %2391 = vmatprep.mubr.msk.f32.mxu1 %vm715_vm1, %v2716_v6 }
 0x75c   : > { %2727 = vtanh.f32 %v1460_v9  ;;  %2392 = vmatmul.mubr.msk.f32.vlgmr.msra.gmra.mrb[24].mxu1 %vm715_vm1, %v2718_v8 }
 0x75d   : > { %2729 = vtanh.f32 %v2382_v7 }
 0x75e   : > { %v2720_v10 = vpop.eup %2719 }
 0x75f   : > { %v2722_v11 = vpop.eup %2721  ;;  %2394 = vmatprep.mubr.msk.f32.mxu1 %vm715_vm1, %v2720_v10 }
 0x760   : > { %2395 = vmatmul.mubr.msk.f32.gmra.mrb[26].mxu1 %vm715_vm1, %v2722_v11 }
 0x762   : > { %v2724_v12 = vpop.eup %2723 }
 0x763   : > { %v2726_v13 = vpop.eup %2725  ;;  %2397 = vmatprep.mubr.msk.f32.mxu1 %vm715_vm1, %v2724_v12 }
 0x764   : > { %2398 = vmatmul.mubr.msk.f32.gmra.mrb[28].mxu1 %vm715_vm1, %v2726_v13 }
 0x766   : > { %v2728_v14 = vpop.eup %2727 }
 0x767   : > { %v2730_v15 = vpop.eup %2729  ;;  %2400 = vmatprep.mubr.msk.f32.mxu1 %vm715_vm1, %v2728_v14 }
 0x768   : > { %2401 = vmatmul.mubr.msk.f32.gmra.mrb[30].mxu1 %vm715_vm1, %v2730_v15 }
 0x82f   : > { %v2393_v16 = vpop.f32.mrb[24].mxu1 }
 0x830   : > { %v1571_v17 = vpop.f32.mrb[25].mxu1 }
 0x831   : > { %v2566_v18 = vpack.c.bf16 %v2393_v16, %v1571_v17 }
 0x833   : > { %v2396_v19 = vpop.f32.mrb[26].mxu1  ;;  %2567 = vmatprep.subr.bf16.mxu0 %v2566_v18 }
 0x834   : > { %v1581_v20 = vpop.f32.mrb[27].mxu1  ;;  %2569 = vmatpush3.bf16.msra.mxu0 %v2566_v18 }
 0x835   : > { %v2570_v21 = vpack.c.bf16 %v2396_v19, %v1581_v20 }
 0x837   : > { %v2399_v22 = vpop.f32.mrb[28].mxu1  ;;  %2571 = vmatprep.subr.bf16.mxu0 %v2570_v21 }
 0x838   : > { %v1591_v23 = vpop.f32.mrb[29].mxu1  ;;  %2573 = vmatpush3.bf16.msra.mxu0 %v2570_v21 }
 0x839   : > { %v2574_v24 = vpack.c.bf16 %v2399_v22, %v1591_v23 }
 0x83b   : > { %v2402_v25 = vpop.f32.mrb[30].mxu1  ;;  %2575 = vmatprep.subr.bf16.mxu0 %v2574_v24 }
 0x83c   : > { %v1601_v26 = vpop.f32.mrb[31].mxu1  ;;  %2577 = vmatpush3.bf16.msra.mxu0 %v2574_v24 }
 0x83d   : > { %v2578_v28 = vpack.c.bf16 %v2402_v25, %v1601_v26 }
 0x83f   : > { %2579 = vmatprep.subr.bf16.mxu0 %v2578_v28 }
 0x840   : > { %2581 = vmatpush3.bf16.msra.mxu0 %v2578_v28 }
 0x843   : > { %2420 = vmatmul.mubr.msk.f32.vlgmr.msra.gmra.mrb[40].mxu0 %vm845_vm2, %v3110_v43  ;;  %v2850_v43 = vmov 0.0  }
 0x844   : > { %2422 = vmatprep.mubr.msk.f32.mxu0 %vm845_vm2, %v3113_v44  ;;  %2447 = vmatprep.mubr.msk.f32.mxu1 %vm2849_vm3, %v2850_v43 }
 0x847   : > { %2423 = vmatmul.mubr.msk.f32.gmra.mrb[42].mxu0 %vm845_vm2, %v3120_v45 }
 0x848   : > { %2425 = vmatprep.mubr.msk.f32.mxu0 %vm845_vm2, %v3123_v46 }
 0x84b   : > { %2426 = vmatmul.mubr.msk.f32.gmra.mrb[44].mxu0 %vm845_vm2, %v3130_v47 }
 0x84c   : > { %2428 = vmatprep.mubr.msk.f32.mxu0 %vm845_vm2, %v3133_v48 }
 0x84f   : > { %2429 = vmatmul.mubr.msk.f32.gmra.mrb[46].mxu0 %vm845_vm2, %v3140_v49 }
 0x916   : > { %v2421_v44 = vpop.f32.mrb[40].mxu0 }
 0x917   : > { %2731 = vtanh.f32 %v2421_v44  ;;  %v1676_v45 = vpop.f32.mrb[41].mxu0 }
 0x918   : > { %2733 = vtanh.f32 %v1676_v45 }
 0x91a   : > { %v2424_v30 = vpop.f32.mrb[42].mxu0 }
 0x91b   : > { %2735 = vtanh.f32 %v2424_v30  ;;  %v1686_v46 = vpop.f32.mrb[43].mxu0 }
 0x91c   : > { %2737 = vtanh.f32 %v1686_v46 }
 0x91e   : > { %v2427_v47 = vpop.f32.mrb[44].mxu0 }
 0x91f   : > { %2739 = vtanh.f32 %v2427_v47  ;;  %v1696_v31 = vpop.f32.mrb[45].mxu0 }
 0x920   : > { %2741 = vtanh.f32 %v1696_v31 }
 0x921   : > { %v2732_v48 = vpop.eup %2731 }
 0x922   : > { %v2734_v32 = vpop.eup %2733  ;;  %v2430_v49 = vpop.f32.mrb[46].mxu0 }
 0x923   : > { %2743 = vtanh.f32 %v2430_v49  ;;  %v1706_v33 = vpop.f32.mrb[47].mxu0  ;;  %v2583_v34 = vpack.c.bf16 %v2732_v48, %v2734_v32 }
 0x924   : > { %2745 = vtanh.f32 %v1706_v33 }
 0x925   : > { %v2736_v35 = vpop.eup %2735  ;;  %2584 = vmatpush3.bf16.msra.mxu1 %v2583_v34 }
 0x926   : > { %v2738_v36 = vpop.eup %2737  ;;  %2585 = vmatprep.subr.bf16.mxu1 %v2848_v29 }
 0x927   : > { %v2586_v37 = vpack.c.bf16 %v2736_v35, %v2738_v36 }
 0x929   : > { %v2740_v38 = vpop.eup %2739  ;;  %2587 = vmatpush3.bf16.msra.mxu1 %v2586_v37 }
 0x92a   : > { %v2742_v39 = vpop.eup %2741  ;;  %2588 = vmatprep.subr.bf16.mxu1 %v2848_v29 }
 0x92b   : > { %v2589_v40 = vpack.c.bf16 %v2740_v38, %v2742_v39 }
 0x92d   : > { %v2744_v41 = vpop.eup %2743  ;;  %2590 = vmatpush3.bf16.msra.mxu1 %v2589_v40 }
 0x92e   : > { %v2746_v42 = vpop.eup %2745  ;;  %2591 = vmatprep.subr.bf16.mxu1 %v2848_v29 }
 0x92f   : > { %v2592_v50 = vpack.c.bf16 %v2744_v41, %v2746_v42 }
 0x931   : > { %2593 = vmatpush3.bf16.msra.mxu1 %v2592_v50 }
 0x934   : > { %2448 = vmatmul.mubr.msk.f32.vlgmr.msra.gmra.mrb[32].mxu1 %vm845_vm2, %v1723_v51 }
 0xa07   : > { %v1793_v52 = vpop.f32.mrb[32].mxu1 }
 0xa08   : > { %v1798_v53 = vmul.f32 0.5, %v1793_v52  ;;  %v2449_v54 = vpop.f32.mrb[33].mxu1 }
 0xa0a   : > { %v1799_v55 = vmul.f32 1.442695, %v1798_v53 }
 0xa0c   : > { %2747 = vpow2.f32 %v1799_v55 }
 0xa16   : > { %v2748_v56 = vpop.eup %2747 }
 0xa17   : > { %1802 = vrot.lane.b32.xlu0 %v2748_v56, %s2851_s29 }
 0xa1b   : > { %1808 = vrot.lane.b32.xlu0 %v1793_v52, %s2852_s30  ;;  %s3260_s30 = scalar_lea.hbm %s3312_s10, %s2020_s25 }
 0xa89   : > { %v1803_v58 = vpop.permute.xlu0 %1802 }
 0xa8a   : > { %v1805_v59 = vmul.f32 %v1803_v58, %v1797_v57 }
 0xa8c   : > { %v1806_v60 = vadd.f32 %v1805_v59, %v1793_v52 }
 0xa8d   : > { %v1809_v61 = vpop.permute.xlu0 %1808 }
 0xa8e   : > { %v1811_v62 = vsel %vm715_vm1, %v1806_v60, %v1809_v61 }
 0xa8f   : > { %v1813_v63 = vsel %vm1812_vm4, %v1811_v62, 0.0 }
 0xa90   : > { %1814 = vst [vmem:[%s396_s27] sm:$0xff] %v1813_v63 }
 0xa91   : > { %2790 = shalt.err (!%p2787_p8)
}
 0xa92   : > { %s2791_s18 = scalar_lea.hbm %s3260_s30, 128  ;;  %s2795_s27 = scalar_lea.hbm %s3312_s10, 256 }
 0xa93   : > { %p2792_p11 = scmp.ne.s32.totalorder %s3260_s30, %s2791_s18  ;;  %p2796_p0 = scmp.lt.u32.totalorder %s3260_s30, %s3312_s10 }
 0xa94   : > { %p2797_p5 = scmp.lt.u32.totalorder %s2795_s27, %s2791_s18  ;;  %p2799_p9 = scmp.lt.u32.totalorder %s2791_s18, %s3260_s30 }
 0xa95   : > { %p2793_p13 = pnand %p2792_p11, %p3325_p10 }
 0xa96   : > { %p2798_p6 = por %p2797_p5, %p2796_p0 }
 0xa97   : > { %p2794_p1 = pneg %p2793_p13 }
 0xa98   : > { %p2800_p12 = por %p2799_p9, %p2798_p6 }
 0xa9a   : > { %p2801_p2 = pnand %p2800_p12, %p2794_p1 }
 0xa9c   : > { %2804 = shalt.err (!%p2801_p2)
}
 0xa9d   : > { %2598 = dma.vmem_to_hbm [thread:$0]  (%p3325_p10), %s3262_s0, 128, %s3260_s30, %s1816_s17  }
 0xa9e PF: > { %p2610_p3 = scmp.ge.s32.totalorder %s2843_s16, 2  ;;  %s1841_s12 = sand.u32 1, %s2831_s13  }
 0xa9f   : > { %p3326_p4 = scmp.ne.s32.totalorder %s3318_s24, 0  ;;  %s1842_s11 = scalar_lea.sflag [#allocation4], %s1841_s12 }
 0xaa1   : > { %p2605_p7 = pnand %p2610_p3, %p3326_p4 }
 0xaa3   : > { %2826 = dma.done.wait (!%p2605_p7), %s1842_s11, 128  }
 0xaa4   : > { %2828 = vsyncadd (!%p2605_p7), %s1842_s11, 4294967168  ;;  %p21_p8 = scmp.ge.s32.totalorder %s2934_s19, 4   ;;  %s3327_s13 = smov %s2835_s14 }
 0xaa5   : > { %s3328_s14 = smov %s2839_s15  ;;  %s3329_s15 = smov %s2945_s22 }
 0xaa6   : > { %s3330_s16 = smov %s2934_s19  ;;  %23 = sbr.rel (!%p21_p8) target bundleno = 6 (0x6), region = 108 }
 0xaad   :  { %1847 = vsyncpa [#allocation3], 1 }
 0xaae   :  { %1849 = vsyncpa [#allocation3 + $0x1], 1 }
 0xaaf   :  { %1850 = vsyncpa [#allocation4], 1 }
 0xab0   :  { %1852 = vsyncpa [#allocation4 + $0x1], 1 }

</bundles_post_ra>
